<compile_context>
chip_gen: v7x
topology: tpu7x:2x2x1
jax: 0.10.0
libtpu: 0.0.40
codegen_flags: <defaults>
</compile_context>

<pallas_src>
import jax
import jax.numpy as jnp
from jax.experimental import pallas as pl
from jax.experimental.pallas import tpu as pltpu

LANES = 128        # lane width of one vreg row (f32)
PARAM_ROWS = 8     # sublanes of one vreg tile

# Row layout of the packed (8, 128) parameter block.
_ROW_W1 = 0   # fc1 weight, transposed -> (H,) in lanes [0, H)
_ROW_B1 = 1   # fc1 bias
_ROW_EPS = 2  # tunable-ReLU epsilon
_ROW_W2 = 3   # fc2 weight row (output_size == 1)
_ROW_B2 = 4   # fc2 bias scalar at lane 0
# rows 5..7 are unused padding.


def pack_params(w1, b1, eps, w2, b2):
    """One-time packing of all parameters into a single (8, 128) f32 block.

    w1: (H, 1)  fc1.weight      b1: (H,)  fc1.bias
    eps: (H,)   tunable epsilon
    w2: (1, H)  fc2.weight      b2: (1,)  fc2.bias
    """
    H = w1.shape[0]
    O = w2.shape[0]
    if H > LANES:
        raise ValueError(f"hidden_size={H} exceeds single-vreg lane width {LANES}")
    if O != 1:
        # Module spec fixes output_size=1; a general O would use a (H, O) matmul path.
        raise NotImplementedError("packed fast path assumes output_size == 1")
    blk = jnp.zeros((PARAM_ROWS, LANES), jnp.float32)
    blk = blk.at[_ROW_W1, :H].set(w1[:, 0].astype(jnp.float32))
    blk = blk.at[_ROW_B1, :H].set(b1.astype(jnp.float32))
    blk = blk.at[_ROW_EPS, :H].set(eps.astype(jnp.float32))
    blk = blk.at[_ROW_W2, :H].set(w2[0, :].astype(jnp.float32))
    blk = blk.at[_ROW_B2, 0].set(b2[0].astype(jnp.float32))
    return blk


def tunable_nn_kernel(x_ref, p_ref, out_ref):
    x = x_ref[...]                       # (TB, 1) f32
    p = p_ref[...]                       # (8, 128) f32 — one vreg, loaded once

    w1t = p[_ROW_W1:_ROW_W1 + 1, :]      # (1, 128)
    b1 = p[_ROW_B1:_ROW_B1 + 1, :]       # (1, 128)
    eps = p[_ROW_EPS:_ROW_EPS + 1, :]    # (1, 128)
    w2 = p[_ROW_W2:_ROW_W2 + 1, :]       # (1, 128)
    b2 = p[_ROW_B2:_ROW_B2 + 1, 0:1]     # (1, 1)

    # CustomLinear just forwards (x, weight, bias); TunableReLU does the math.
    # output = x_expanded * weight.t()  -> broadcast (TB,1)*(1,128) = (TB,128)
    output = x * w1t

    zeros = jnp.zeros_like(output)
    positive_sum = jnp.where(output > 0, output, zeros)
    negative_sum = jnp.where(output < 0, output, zeros)

    zeros_b = jnp.zeros_like(b1)
    mu = positive_sum + jnp.where(b1 >= 0, b1, zeros_b)
    nu = negative_sum + jnp.where(b1 < 0, b1, zeros_b)

    temp = mu - nu - eps
    term = temp * temp + 4.0 * mu * eps
    activation = temp + jnp.sqrt(term)   # (TB, 128); padded lanes are exactly 0

    # fc2 (output_size=1): VPU multiply + cross-lane (XLU) reduce instead of an
    # MXU matmul that would be >99% padding at (TB,10)x(10,1).
    y = jnp.sum(activation * w2, axis=-1, keepdims=True)   # (TB, 1)
    out_ref[...] = y + b2


def _round_up(n, m):
    return ((n + m - 1) // m) * m


def tunable_nn_forward(x, packed_params):
    """x: (B, 1) f32; packed_params: (8, 128) f32 from pack_params()."""
    B = x.shape[0]
    x = x.astype(jnp.float32)

    # Batch tile: multiple of 8 sublanes, capped at 512 rows per grid step.
    tb = min(512, _round_up(max(B, 1), 8))
    b_pad = _round_up(B, tb)
    if b_pad != B:
        x = jnp.pad(x, ((0, b_pad - B), (0, 0)))

    out = pl.pallas_call(
        tunable_nn_kernel,
        out_shape=jax.ShapeDtypeStruct((b_pad, 1), jnp.float32),
        grid=(b_pad // tb,),
        in_specs=[
            pl.BlockSpec((tb, 1), lambda i: (i, 0)),
            pl.BlockSpec((PARAM_ROWS, LANES), lambda i: (0, 0)),  # resident params
        ],
        out_specs=pl.BlockSpec((tb, 1), lambda i: (i, 0)),
        compiler_params=pltpu.CompilerParams(
            dimension_semantics=("parallel",)),   # shards batch across v7x's 2 TCs
    )(x, packed_params)

    return out[:B] if b_pad != B else out


if __name__ == "__main__":
    input_size = 1
    hidden_size = 10
    output_size = 1
    epsilon_init = 0.1
    batch = 8

    key = jax.random.PRNGKey(0)
    k_x, k_w1, k_b1, k_w2, k_b2 = jax.random.split(key, 5)

    # Deterministic parameter init (shapes match the torch module's __init__).
    x = jax.random.normal(k_x, (batch, input_size), dtype=jnp.float32)
    w1 = jax.random.normal(k_w1, (hidden_size, input_size), dtype=jnp.float32)   # fc1.weight
    b1 = jax.random.normal(k_b1, (hidden_size,), dtype=jnp.float32)              # fc1.bias
    eps = jnp.full((hidden_size,), epsilon_init, dtype=jnp.float32)              # tunable_relu.epsilon
    w2 = jax.random.normal(k_w2, (output_size, hidden_size), dtype=jnp.float32)  # fc2.weight
    b2 = jax.random.normal(k_b2, (output_size,), dtype=jnp.float32)              # fc2.bias

    # One-time packing (hoisted out of the per-call hot path).
    packed = jax.block_until_ready(pack_params(w1, b1, eps, w2, b2))

    fwd = jax.jit(tunable_nn_forward)
    out = jax.block_until_ready(fwd(x, packed))

    # Pure-JAX reference of the same module math.
    # TODO(synk): TunableReLU.epsilon_history (Python-side list bookkeeping) has no kernel equivalent.
    output = x * w1.T
    pos = jnp.where(output > 0, output, 0.0)
    neg = jnp.where(output < 0, output, 0.0)
    mu = pos + jnp.where(b1 >= 0, b1, 0.0)[None, :]
    nu = neg + jnp.where(b1 < 0, b1, 0.0)[None, :]
    temp = mu - nu - eps[None, :]
    act = temp + jnp.sqrt(temp * temp + 4.0 * mu * eps[None, :])
    ref = act @ w2.T + b2[None, :]

    assert out.shape == (batch, output_size), out.shape
    assert jnp.allclose(out, ref, atol=1e-5, rtol=1e-5), (out, ref)

    print("KERNEL_OK")
</pallas_src>

<mosaic_0001>
module attributes {stable_mosaic.version = 11 : i64} {
  func.func @tunable_nn_kernel(%arg0: i32, %arg1: memref<8x1xf32, #tpu.memory_space<vmem>>, %arg2: memref<8x128xf32, #tpu.memory_space<vmem>>, %arg3: memref<8x1xf32, #tpu.memory_space<vmem>>) attributes {dimension_semantics = [#tpu.dimension_semantics<parallel>], iteration_bounds = array<i64: 1>, scalar_prefetch = 0 : i64, scratch_operands = 0 : i64, tpu.core_type = #tpu.core_type<tc>, window_params = [{transform_indices = @transform_0, window_bounds = array<i64: 8, 1>}, {pipeline_mode = #tpu.pipeline_mode<synchronous>, transform_indices = @transform_1, window_bounds = array<i64: 8, 128>}, {transform_indices = @transform_2, window_bounds = array<i64: 8, 1>}]} {
    %c0 = arith.constant 0 : index
    %c0_0 = arith.constant 0 : index
    %0 = vector.load %arg1[%c0, %c0_0] : memref<8x1xf32, #tpu.memory_space<vmem>>, vector<8x1xf32>
    %c0_1 = arith.constant 0 : index
    %c0_2 = arith.constant 0 : index
    %1 = vector.load %arg2[%c0_1, %c0_2] : memref<8x128xf32, #tpu.memory_space<vmem>>, vector<8x128xf32>
    %2 = vector.extract_strided_slice %1 {offsets = [0, 0], sizes = [1, 128], strides = [1, 1]} : vector<8x128xf32> to vector<1x128xf32>
    %3 = vector.extract_strided_slice %1 {offsets = [1, 0], sizes = [1, 128], strides = [1, 1]} : vector<8x128xf32> to vector<1x128xf32>
    %4 = vector.extract_strided_slice %1 {offsets = [2, 0], sizes = [1, 128], strides = [1, 1]} : vector<8x128xf32> to vector<1x128xf32>
    %5 = vector.extract_strided_slice %1 {offsets = [3, 0], sizes = [1, 128], strides = [1, 1]} : vector<8x128xf32> to vector<1x128xf32>
    %6 = vector.extract_strided_slice %1 {offsets = [4, 0], sizes = [1, 1], strides = [1, 1]} : vector<8x128xf32> to vector<1x1xf32>
    %7 = vector.broadcast %0 : vector<8x1xf32> to vector<8x128xf32>
    %8 = vector.broadcast %2 : vector<1x128xf32> to vector<8x128xf32>
    %9 = arith.mulf %7, %8 : vector<8x128xf32>
    %cst = arith.constant 0.000000e+00 : f32
    %10 = vector.broadcast %cst : f32 to vector<8x128xf32>
    %cst_3 = arith.constant 0.000000e+00 : f32
    %11 = vector.broadcast %cst_3 : f32 to vector<8x128xf32>
    %12 = arith.cmpf ogt, %9, %11 : vector<8x128xf32>
    %13 = arith.select %12, %9, %10 : vector<8x128xi1>, vector<8x128xf32>
    %cst_4 = arith.constant 0.000000e+00 : f32
    %14 = vector.broadcast %cst_4 : f32 to vector<8x128xf32>
    %15 = arith.cmpf olt, %9, %14 : vector<8x128xf32>
    %16 = arith.select %15, %9, %10 : vector<8x128xi1>, vector<8x128xf32>
    %cst_5 = arith.constant 0.000000e+00 : f32
    %17 = vector.broadcast %cst_5 : f32 to vector<1x128xf32>
    %cst_6 = arith.constant 0.000000e+00 : f32
    %18 = vector.broadcast %cst_6 : f32 to vector<1x128xf32>
    %19 = arith.cmpf oge, %3, %18 : vector<1x128xf32>
    %20 = arith.select %19, %3, %17 : vector<1x128xi1>, vector<1x128xf32>
    %21 = vector.broadcast %20 : vector<1x128xf32> to vector<8x128xf32>
    %22 = arith.addf %13, %21 : vector<8x128xf32>
    %cst_7 = arith.constant 0.000000e+00 : f32
    %23 = vector.broadcast %cst_7 : f32 to vector<1x128xf32>
    %24 = arith.cmpf olt, %3, %23 : vector<1x128xf32>
    %25 = arith.select %24, %3, %17 : vector<1x128xi1>, vector<1x128xf32>
    %26 = vector.broadcast %25 : vector<1x128xf32> to vector<8x128xf32>
    %27 = arith.addf %16, %26 : vector<8x128xf32>
    %28 = arith.subf %22, %27 : vector<8x128xf32>
    %29 = vector.broadcast %4 : vector<1x128xf32> to vector<8x128xf32>
    %30 = arith.subf %28, %29 : vector<8x128xf32>
    %31 = arith.mulf %30, %30 : vector<8x128xf32>
    %cst_8 = arith.constant 4.000000e+00 : f32
    %32 = vector.broadcast %cst_8 : f32 to vector<8x128xf32>
    %33 = arith.mulf %32, %22 : vector<8x128xf32>
    %34 = vector.broadcast %4 : vector<1x128xf32> to vector<8x128xf32>
    %35 = arith.mulf %33, %34 : vector<8x128xf32>
    %36 = arith.addf %31, %35 : vector<8x128xf32>
    %37 = math.sqrt %36 : vector<8x128xf32>
    %38 = arith.addf %30, %37 : vector<8x128xf32>
    %39 = vector.broadcast %5 : vector<1x128xf32> to vector<8x128xf32>
    %40 = arith.mulf %38, %39 : vector<8x128xf32>
    %cst_9 = arith.constant dense<0.000000e+00> : vector<8xf32>
    %41 = vector.multi_reduction <add>, %40, %cst_9 [1] : vector<8x128xf32> to vector<8xf32>
    %42 = vector.shape_cast %41 : vector<8xf32> to vector<8x1xf32>
    %43 = vector.broadcast %6 : vector<1x1xf32> to vector<8x1xf32>
    %44 = arith.addf %42, %43 : vector<8x1xf32>
    %c0_10 = arith.constant 0 : index
    %c0_11 = arith.constant 0 : index
    %45 = vector.load %arg3[%c0_10, %c0_11] : memref<8x1xf32, #tpu.memory_space<vmem>>, vector<8x1xf32>
    tpu.vector_store %arg3[%c0_10, %c0_11], %44 {strides = array<i32>} : memref<8x1xf32, #tpu.memory_space<vmem>>, vector<8x1xf32>,
    return
  }
  func.func @transform_0(%arg0: i32) -> (i32, i32) {
    %c0_i32 = arith.constant 0 : i32
    %c0_i32_0 = arith.constant 0 : i32
    return %arg0, %c0_i32 : i32, i32
  }
  func.func @transform_1(%arg0: i32) -> (i32, i32) {
    %c0_i32 = arith.constant 0 : i32
    %c0_i32_0 = arith.constant 0 : i32
    %c0_i32_1 = arith.constant 0 : i32
    return %c0_i32, %c0_i32_0 : i32, i32
  }
  func.func @transform_2(%arg0: i32) -> (i32, i32) {
    %c0_i32 = arith.constant 0 : i32
    %c0_i32_0 = arith.constant 0 : i32
    return %arg0, %c0_i32 : i32, i32
  }
}

</mosaic_0001>

<bundles_post_ra>
// kernel: tunable_nn_forward.1
= control target key start
LH: loop header
LB: loop body
LE: loop exit
PB: predicated region body
PF: predicated region fallthrough
CT: control target
= control target key end

     0   :  { %v81_v0 = vmov 0   ;;  %v18_v2 = vlaneseq  ;;  %vm71_vm6 = vcmask 7168   ;;  %s106_s0 = inlined_call_operand.vmem [shape: f32[8,1], index: 0, kind: input, shape index: {}]   ;;  %s107_s1 = inlined_call_operand.vmem [shape: f32[8,128], index: 1, kind: input, shape index: {}]   ;;  %s108_s2 = inlined_call_operand.vmem [shape: f32[8,1], index: 2, kind: output, shape index: {}]  }
   0x1   :  { %78 = vset.pattern.permute.xlu0 %v81_v0  ;;  %v11_v1 = vld [vmem:[%s106_s0] sm:$0xff] }
   0x2   :  { %15 = vperm.xlu0 %78, %v11_v1   ;;  %v19_v3 = vshrl.u32 %v18_v2, 7  ;;  %v12_v5 = vld [vmem:[%s107_s1] sm:$0xff] }
   0x3   :  { %vm27_vm0 = vcmp.ge.f32.partialorder %v12_v5, 0.0  ;;  %vm34_vm1 = vcmp.lt.f32.partialorder %v12_v5, 0.0 }
   0x4   :  { %v68_v4 = vsub.s32 4, %v19_v3  ;;  %v20_v7 = vsub.s32 0, %v19_v3  ;;  %v31_v9 = vsub.s32 1, %v19_v3  ;;  %v28_v10 = vsel %vm27_vm0, %v12_v5, 0.0 }
   0x5   :  { %v35_v11 = vsel %vm34_vm1, %v12_v5, 0.0  ;;  %v44_v16 = vsub.s32 2, %v19_v3  ;;  %v61_v28 = vsub.s32 3, %v19_v3 }
   0x6   :  { %v69_v6 = vrot.slane %v12_v5, %v68_v4  ;;  %v21_v8 = vrot.slane %v12_v5, %v20_v7  ;;  %v32_v14 = vrot.slane %v28_v10, %v31_v9  ;;  %v39_v15 = vrot.slane %v35_v11, %v31_v9 }
   0x7   :  { %v45_v21 = vrot.slane %v12_v5, %v44_v16  ;;  %v62_v33 = vrot.slane %v12_v5, %v61_v28 }
  0x81   :  { %v16_v12 = vpop.permute.xlu0 %15 }
  0x82   :  { %v22_v13 = vmul.f32 %v21_v8, %v16_v12 }
  0x84   :  { %vm23_vm2 = vcmp.gt.f32.partialorder %v22_v13, 0.0  ;;  %vm25_vm3 = vcmp.lt.f32.partialorder %v22_v13, 0.0 }
  0x85   :  { %v24_v17 = vsel %vm23_vm2, %v22_v13, 0.0  ;;  %v26_v18 = vsel %vm25_vm3, %v22_v13, 0.0 }
  0x86   :  { %v33_v19 = vadd.f32 %v32_v14, %v24_v17  ;;  %v40_v20 = vadd.f32 %v39_v15, %v26_v18 }
  0x88   :  { %v41_v22 = vsub.f32 %v33_v19, %v40_v20  ;;  %v48_v23 = vmul.f32 4.0, %v33_v19 }
  0x8a   :  { %v46_v24 = vsub.f32 %v41_v22, %v45_v21  ;;  %v49_v26 = vmul.f32 %v48_v23, %v45_v21 }
  0x8c   :  { %v47_v25 = vmul.f32 %v46_v24, %v46_v24 }
  0x8e   :  { %v50_v27 = vadd.f32 %v49_v26, %v47_v25 }
  0x90   :  { %79 = vrsqrt.f32 %v50_v27  ;;  %vm53_vm4 = vcmp.eq.f32.partialorder %v50_v27, inf  ;;  %v56_v31 = vand.u32 2147483648, %v50_v27  ;;  %vm55_vm5 = vcmp.eq.f32.partialorder %v50_v27, 0.0 }
  0x9a   :  { %v80_v29 = vpop.eup %79 }
  0x9b   :  { %v52_v30 = vmul.f32 %v80_v29, %v50_v27 }
  0x9d   :  { %v54_v32 = vsel %vm53_vm4, %v50_v27, %v52_v30 }
  0x9e   :  { %v57_v34 = vsel %vm55_vm5, %v56_v31, %v54_v32 }
  0x9f   :  { %v58_v35 = vadd.f32 %v57_v34, %v46_v24 }
  0xa1   :  { %v63_v36 = vmul.f32 %v62_v33, %v58_v35 }
  0xa3   :  { %64 = vadd.xlane.f32.xlu0 %v63_v36 }
 0x130   :  { %v65_v37 = vpop.xlane.xlu0 %64 }
 0x131   :  { %v70_v38 = vadd.f32 %v69_v6, %v65_v37 }
 0x133   :  { %72 = vst.msk [vmem:[%s108_s2] sm:$0xff] %vm71_vm6, %v70_v38 }

</bundles_post_ra>
